<compile_context>
chip_gen: v5e
topology: v5e:2x2
jax: 0.10.0
libtpu: 0.0.40
codegen_flags: <defaults>
</compile_context>

<pallas_src>
import jax
import jax.numpy as jnp
from jax import lax
from jax.experimental import pallas as pl
from jax.experimental.pallas import tpu as pltpu


IN_DIM = 32
MEM_DIM = 32
NUM_CLASSES = 8
GATES = 4 * MEM_DIM          # 128  (== one full lane tile)
LANE = 128


# ---------------------------------------------------------------------------
# Pallas kernel: single invocation, sequential in-kernel walk over all nodes
# ---------------------------------------------------------------------------
def tree_lstm_kernel(coff_ref, ccnt_ref, cidx_ref,            # scalar-prefetch (SMEM)
                     xs_ref,                                  # (n_pad, IN_DIM)   VMEM
                     wih1_ref, whh1_ref, b1_ref,              # cell1 weights     VMEM
                     wih2_ref, whh2_ref, b2_ref,              # cell2 weights     VMEM
                     fcw_ref, fcb_ref,                        # lane-padded FC    VMEM
                     out_ref,                                 # (1, LANE) logits
                     state_ref):                              # (n_pad, 128) scratch
    m = MEM_DIM
    n_nodes = coff_ref.shape[0]          # static (one entry per tree node)

    def node_body(n, carry):
        # ---- sum child states from the resident packed state table ----------
        off = coff_ref[n]
        cnt = ccnt_ref[n]

        def sum_child(i, acc):
            ci = cidx_ref[off + i]
            return acc + state_ref[pl.ds(ci, 1), :]

        child_sum = lax.fori_loop(0, cnt, sum_child,
                                  jnp.zeros((1, 4 * m), jnp.float32))
        child_h1 = child_sum[:, 0 * m:1 * m]
        child_c1 = child_sum[:, 1 * m:2 * m]
        child_h2 = child_sum[:, 2 * m:3 * m]
        child_c2 = child_sum[:, 3 * m:4 * m]

        x = xs_ref[pl.ds(n, 1), :]                            # (1, IN_DIM)

        # ---- cell1 : LSTMCell(in_dim, mem_dim) ------------------------------
        gates1 = (jnp.dot(x, wih1_ref[...], preferred_element_type=jnp.float32)
                  + jnp.dot(child_h1, whh1_ref[...],
                            preferred_element_type=jnp.float32)
                  + b1_ref[...])
        i1 = jax.nn.sigmoid(gates1[:, 0 * m:1 * m])
        f1 = jax.nn.sigmoid(gates1[:, 1 * m:2 * m])
        g1 = jnp.tanh(gates1[:, 2 * m:3 * m])
        o1 = jax.nn.sigmoid(gates1[:, 3 * m:4 * m])
        c1 = f1 * child_c1 + i1 * g1
        h1 = o1 * jnp.tanh(c1)

        # ---- cell2 : LSTMCell(mem_dim, mem_dim), input = c1 (state[1]) ------
        gates2 = (jnp.dot(c1, wih2_ref[...], preferred_element_type=jnp.float32)
                  + jnp.dot(child_h2, whh2_ref[...],
                            preferred_element_type=jnp.float32)
                  + b2_ref[...])
        i2 = jax.nn.sigmoid(gates2[:, 0 * m:1 * m])
        f2 = jax.nn.sigmoid(gates2[:, 1 * m:2 * m])
        g2 = jnp.tanh(gates2[:, 2 * m:3 * m])
        o2 = jax.nn.sigmoid(gates2[:, 3 * m:4 * m])
        c2 = f2 * child_c2 + i2 * g2
        h2 = o2 * jnp.tanh(c2)

        # ---- one lane-dense 128-wide store: [h1 | c1 | h2 | c2] --------------
        state_ref[pl.ds(n, 1), :] = jnp.concatenate([h1, c1, h2, c2], axis=-1)
        return carry

    lax.fori_loop(0, n_nodes, node_body, 0)

    # ---- fused FC on the root's c2 (root is last in post-order) -------------
    root_row = state_ref[pl.ds(n_nodes - 1, 1), :]
    root_c2 = root_row[:, 3 * m:4 * m]
    out_ref[...] = (jnp.dot(root_c2, fcw_ref[...],
                            preferred_element_type=jnp.float32)
                    + fcb_ref[...])


# ---------------------------------------------------------------------------
# Host wrapper: one pallas_call for the whole tree
# ---------------------------------------------------------------------------
def tree_lstm_pallas(xs, child_off, child_cnt, child_idx, params):
    n_nodes = xs.shape[0]
    n_pad = max(8, ((n_nodes + 7) // 8) * 8)

    # sublane-pad the node inputs so the VMEM block is (8,*)-aligned
    xs_pad = jnp.zeros((n_pad, IN_DIM), jnp.float32).at[:n_nodes, :].set(xs)

    const = lambda i, *_: (0, 0)    # everything stays resident (DMA'd once)

    grid_spec = pltpu.PrefetchScalarGridSpec(
        num_scalar_prefetch=3,
        grid=(1,),
        in_specs=[
            pl.BlockSpec((n_pad, IN_DIM), const),         # xs (post-order)
            pl.BlockSpec((IN_DIM, GATES), const),         # W_ih1.T
            pl.BlockSpec((MEM_DIM, GATES), const),        # W_hh1.T
            pl.BlockSpec((1, GATES), const),              # b_ih1 + b_hh1
            pl.BlockSpec((MEM_DIM, GATES), const),        # W_ih2.T
            pl.BlockSpec((MEM_DIM, GATES), const),        # W_hh2.T
            pl.BlockSpec((1, GATES), const),              # b_ih2 + b_hh2
            pl.BlockSpec((MEM_DIM, LANE), const),         # fc_w (lane-padded)
            pl.BlockSpec((1, LANE), const),               # fc_b (lane-padded)
        ],
        out_specs=pl.BlockSpec((1, LANE), const),
        scratch_shapes=[pltpu.VMEM((n_pad, GATES), jnp.float32)],  # node-state table
    )

    logits_pad = pl.pallas_call(
        tree_lstm_kernel,
        grid_spec=grid_spec,
        out_shape=jax.ShapeDtypeStruct((1, LANE), jnp.float32),
    )(child_off, child_cnt, child_idx,
      xs_pad,
      params["wih1"], params["whh1"], params["b1"],
      params["wih2"], params["whh2"], params["b2"],
      params["fc_w_pad"], params["fc_b_pad"])

    return logits_pad[:, :NUM_CLASSES]


# ---------------------------------------------------------------------------
# Tree structure + host-side flattening to post-order tables
# ---------------------------------------------------------------------------
class Tree:
    def __init__(self, x, children=()):
        self.x = x                      # (IN_DIM,) vector
        self.children = list(children)
        self.num_children = len(self.children)


def flatten_tree(root):
    """Post-order flatten: children always appear before their parent."""
    nodes = []

    def visit(t):
        for c in t.children:
            visit(c)
        t._idx = len(nodes)
        nodes.append(t)

    visit(root)
    xs = jnp.stack([node.x for node in nodes]).astype(jnp.float32)   # (N, IN_DIM)

    child_idx, child_off, child_cnt = [], [], []
    for node in nodes:
        child_off.append(len(child_idx))
        child_cnt.append(node.num_children)
        child_idx.extend(c._idx for c in node.children)
    if not child_idx:
        child_idx = [0]                 # keep SMEM table non-empty

    return (xs,
            jnp.asarray(child_off, jnp.int32),
            jnp.asarray(child_cnt, jnp.int32),
            jnp.asarray(child_idx, jnp.int32))


def tree_lstm_forward(tree, params):
    # TODO(synk): the recursive Python tree walk has no in-kernel equivalent;
    # it is flattened host-side into post-order index tables consumed via SMEM.
    xs, coff, ccnt, cidx = flatten_tree(tree)
    return tree_lstm_pallas(xs, coff, ccnt, cidx, params)


# ---------------------------------------------------------------------------
# Deterministic parameter init (same shapes / distributions as nn.LSTMCell,
# nn.Linear), packed into the kernel layout (pre-transposed, lane-padded FC).
# ---------------------------------------------------------------------------
def init_params(key):
    ks = jax.random.split(key, 10)
    bound = 1.0 / jnp.sqrt(jnp.float32(MEM_DIM))

    def u(k, shape):
        return jax.random.uniform(k, shape, jnp.float32, -bound, bound)

    # torch nn.LSTMCell layout: weight_ih (4M, in), weight_hh (4M, M),
    # bias_ih (4M,), bias_hh (4M,).  Gate order [i, f, g, o].
    w_ih1 = u(ks[0], (GATES, IN_DIM))
    w_hh1 = u(ks[1], (GATES, MEM_DIM))
    b1 = (u(ks[2], (GATES,)) + u(ks[3], (GATES,))).reshape(1, -1)

    w_ih2 = u(ks[4], (GATES, MEM_DIM))
    w_hh2 = u(ks[5], (GATES, MEM_DIM))
    b2 = (u(ks[6], (GATES,)) + u(ks[7], (GATES,))).reshape(1, -1)

    fc_w = u(ks[8], (NUM_CLASSES, MEM_DIM))     # nn.Linear layout (out, in)
    fc_b = u(ks[9], (NUM_CLASSES,))

    # lane-padded FC (columns 0..NUM_CLASSES-1 real, rest zero)
    fc_w_pad = jnp.zeros((MEM_DIM, LANE), jnp.float32).at[:, :NUM_CLASSES].set(fc_w.T)
    fc_b_pad = jnp.zeros((1, LANE), jnp.float32).at[:, :NUM_CLASSES].set(fc_b)

    return dict(
        # kernel layout (pre-transposed)
        wih1=w_ih1.T, whh1=w_hh1.T, b1=b1,
        wih2=w_ih2.T, whh2=w_hh2.T, b2=b2,
        fc_w_pad=fc_w_pad, fc_b_pad=fc_b_pad,
        # raw weights for the pure-JAX reference check
        w_ih1=w_ih1, w_hh1=w_hh1, w_ih2=w_ih2, w_hh2=w_hh2,
        b1_raw=b1, b2_raw=b2, fc_w=fc_w, fc_b=fc_b)


# ---------------------------------------------------------------------------
# Pure-JAX reference (mirrors the PyTorch recursion) for a correctness check
# ---------------------------------------------------------------------------
def _lstm_cell_ref(x, h, c, w_ih, w_hh, b):
    gates = x @ w_ih.T + h @ w_hh.T + b
    m = MEM_DIM
    i = jax.nn.sigmoid(gates[:, 0 * m:1 * m])
    f = jax.nn.sigmoid(gates[:, 1 * m:2 * m])
    g = jnp.tanh(gates[:, 2 * m:3 * m])
    o = jax.nn.sigmoid(gates[:, 3 * m:4 * m])
    c_new = f * c + i * g
    h_new = o * jnp.tanh(c_new)
    return h_new, c_new


def tree_lstm_reference(tree, params):
    def rec(t):
        ch1 = cc1 = ch2 = cc2 = jnp.zeros((1, MEM_DIM), jnp.float32)
        for child in t.children:
            s = rec(child)
            ch1, cc1, ch2, cc2 = ch1 + s[0], cc1 + s[1], ch2 + s[2], cc2 + s[3]
        x = t.x.reshape(1, IN_DIM)
        h1, c1 = _lstm_cell_ref(x, ch1, cc1, params["w_ih1"], params["w_hh1"],
                                params["b1_raw"])
        h2, c2 = _lstm_cell_ref(c1, ch2, cc2, params["w_ih2"], params["w_hh2"],
                                params["b2_raw"])
        return [h1, c1, h2, c2]

    state = rec(tree)
    return state[3] @ params["fc_w"].T + params["fc_b"].reshape(1, -1)


# ---------------------------------------------------------------------------
# Example tree (deterministic)
# ---------------------------------------------------------------------------
def build_tree(key):
    """        root
              /    \
            n1      n2
           /  \
         leaf  leaf
    """
    ks = jax.random.split(key, 5)
    xs = [jax.random.normal(k, (IN_DIM,), jnp.float32) for k in ks]
    leaf_a = Tree(xs[0])
    leaf_b = Tree(xs[1])
    n1 = Tree(xs[2], children=(leaf_a, leaf_b))
    n2 = Tree(xs[3])
    root = Tree(xs[4], children=(n1, n2))
    return root


if __name__ == "__main__":
    key = jax.random.PRNGKey(0)
    k_params, k_tree = jax.random.split(key)

    params = init_params(k_params)
    tree = build_tree(k_tree)

    out = tree_lstm_forward(tree, params)        # (1, NUM_CLASSES)
    out = jax.block_until_ready(out)

    assert out.shape == (1, NUM_CLASSES)
    assert bool(jnp.all(jnp.isfinite(out)))

    ref = tree_lstm_reference(tree, params)
    assert bool(jnp.allclose(out, ref, atol=2e-3, rtol=2e-3)), (
        f"mismatch: max abs diff {float(jnp.max(jnp.abs(out - ref)))}")

    print("KERNEL_OK")
</pallas_src>

<mosaic_0001>
module attributes {stable_mosaic.version = 11 : i64} {
  func.func @tree_lstm_kernel(%arg0: i32, %arg1: memref<5xi32, #tpu.memory_space<smem>>, %arg2: memref<5xi32, #tpu.memory_space<smem>>, %arg3: memref<4xi32, #tpu.memory_space<smem>>, %arg4: memref<8x32xf32, #tpu.memory_space<vmem>>, %arg5: memref<32x128xf32, #tpu.memory_space<vmem>>, %arg6: memref<32x128xf32, #tpu.memory_space<vmem>>, %arg7: memref<1x128xf32, #tpu.memory_space<vmem>>, %arg8: memref<32x128xf32, #tpu.memory_space<vmem>>, %arg9: memref<32x128xf32, #tpu.memory_space<vmem>>, %arg10: memref<1x128xf32, #tpu.memory_space<vmem>>, %arg11: memref<32x128xf32, #tpu.memory_space<vmem>>, %arg12: memref<1x128xf32, #tpu.memory_space<vmem>>, %arg13: memref<1x128xf32, #tpu.memory_space<vmem>>, %arg14: memref<8x128xf32, #tpu.memory_space<vmem>>) attributes {dimension_semantics = [#tpu.dimension_semantics<arbitrary>], iteration_bounds = array<i64: 1>, scalar_prefetch = 3 : i64, scratch_operands = 1 : i64, tpu.core_type = #tpu.core_type<tc>, window_params = [{pipeline_mode = #tpu.pipeline_mode<synchronous>, transform_indices = @transform_0, window_bounds = array<i64: 8, 32>}, {pipeline_mode = #tpu.pipeline_mode<synchronous>, transform_indices = @transform_1, window_bounds = array<i64: 32, 128>}, {pipeline_mode = #tpu.pipeline_mode<synchronous>, transform_indices = @transform_2, window_bounds = array<i64: 32, 128>}, {pipeline_mode = #tpu.pipeline_mode<synchronous>, transform_indices = @transform_3, window_bounds = array<i64: 1, 128>}, {pipeline_mode = #tpu.pipeline_mode<synchronous>, transform_indices = @transform_4, window_bounds = array<i64: 32, 128>}, {pipeline_mode = #tpu.pipeline_mode<synchronous>, transform_indices = @transform_5, window_bounds = array<i64: 32, 128>}, {pipeline_mode = #tpu.pipeline_mode<synchronous>, transform_indices = @transform_6, window_bounds = array<i64: 1, 128>}, {pipeline_mode = #tpu.pipeline_mode<synchronous>, transform_indices = @transform_7, window_bounds = array<i64: 32, 128>}, {pipeline_mode = #tpu.pipeline_mode<synchronous>, transform_indices = @transform_8, window_bounds = array<i64: 1, 128>}, {pipeline_mode = #tpu.pipeline_mode<synchronous>, transform_indices = @transform_9, window_bounds = array<i64: 1, 128>}]} {
    %c0_i32 = arith.constant 0 : i32
    %c5_i32 = arith.constant 5 : i32
    %0 = arith.addi %c0_i32, %c5_i32 : i32
    %c1_i32 = arith.constant 1 : i32
    scf.for %arg15 = %c0_i32 to %0 step %c1_i32  : i32 {
      %8 = arith.index_cast %arg15 : i32 to index
      %9 = memref.load %arg1[%8] : memref<5xi32, #tpu.memory_space<smem>>
      %10 = arith.index_cast %arg15 : i32 to index
      %11 = memref.load %arg2[%10] : memref<5xi32, #tpu.memory_space<smem>>
      %cst_7 = arith.constant 0.000000e+00 : f32
      %12 = vector.broadcast %cst_7 : f32 to vector<1x128xf32>
      %c0_i32_8 = arith.constant 0 : i32
      %13 = arith.subi %11, %c0_i32_8 : i32
      %14 = arith.addi %c0_i32_8, %13 : i32
      %c1_i32_9 = arith.constant 1 : i32
      %15 = scf.for %arg16 = %c0_i32_8 to %14 step %c1_i32_9 iter_args(%arg17 = %12) -> (vector<1x128xf32>)  : i32 {
        %89 = arith.addi %9, %arg16 : i32
        %90 = arith.index_cast %89 : i32 to index
        %91 = memref.load %arg3[%90] : memref<4xi32, #tpu.memory_space<smem>>
        %92 = arith.index_cast %91 : i32 to index
        %c0_34 = arith.constant 0 : index
        %93 = vector.load %arg14[%92, %c0_34] : memref<8x128xf32, #tpu.memory_space<vmem>>, vector<1x128xf32>
        %94 = arith.addf %arg17, %93 : vector<1x128xf32>
        scf.yield %94 : vector<1x128xf32>
      }
      %16 = vector.extract_strided_slice %15 {offsets = [0, 0], sizes = [1, 32], strides = [1, 1]} : vector<1x128xf32> to vector<1x32xf32>
      %17 = vector.extract_strided_slice %15 {offsets = [0, 32], sizes = [1, 32], strides = [1, 1]} : vector<1x128xf32> to vector<1x32xf32>
      %18 = vector.extract_strided_slice %15 {offsets = [0, 64], sizes = [1, 32], strides = [1, 1]} : vector<1x128xf32> to vector<1x32xf32>
      %19 = vector.extract_strided_slice %15 {offsets = [0, 96], sizes = [1, 32], strides = [1, 1]} : vector<1x128xf32> to vector<1x32xf32>
      %20 = arith.index_cast %arg15 : i32 to index
      %c0_10 = arith.constant 0 : index
      %21 = vector.load %arg4[%20, %c0_10] : memref<8x32xf32, #tpu.memory_space<vmem>>, vector<1x32xf32>
      %c0_11 = arith.constant 0 : index
      %c0_12 = arith.constant 0 : index
      %22 = vector.load %arg5[%c0_11, %c0_12] : memref<32x128xf32, #tpu.memory_space<vmem>>, vector<32x128xf32>
      %cst_13 = arith.constant dense<0.000000e+00> : vector<1x128xf32>
      %23 = tpu.matmul %21, %22, %cst_13 {dimension_numbers = #tpu.dot_dimension_numbers<[1], [0], [0], [1], [0, 0, 1, 1], [], []>} : vector<1x32xf32>, vector<32x128xf32>, vector<1x128xf32> -> vector<1x128xf32>
      %c0_14 = arith.constant 0 : index
      %c0_15 = arith.constant 0 : index
      %24 = vector.load %arg6[%c0_14, %c0_15] : memref<32x128xf32, #tpu.memory_space<vmem>>, vector<32x128xf32>
      %cst_16 = arith.constant dense<0.000000e+00> : vector<1x128xf32>
      %25 = tpu.matmul %16, %24, %cst_16 {dimension_numbers = #tpu.dot_dimension_numbers<[1], [0], [0], [1], [0, 0, 1, 1], [], []>} : vector<1x32xf32>, vector<32x128xf32>, vector<1x128xf32> -> vector<1x128xf32>
      %26 = arith.addf %23, %25 : vector<1x128xf32>
      %c0_17 = arith.constant 0 : index
      %c0_18 = arith.constant 0 : index
      %27 = vector.load %arg7[%c0_17, %c0_18] : memref<1x128xf32, #tpu.memory_space<vmem>>, vector<1x128xf32>
      %28 = arith.addf %26, %27 : vector<1x128xf32>
      %29 = vector.extract_strided_slice %28 {offsets = [0, 0], sizes = [1, 32], strides = [1, 1]} : vector<1x128xf32> to vector<1x32xf32>
      %30 = arith.negf %29 : vector<1x32xf32>
      %31 = math.exp %30 : vector<1x32xf32>
      %cst_19 = arith.constant 1.000000e+00 : f32
      %32 = vector.broadcast %cst_19 : f32 to vector<1x32xf32>
      %33 = arith.addf %32, %31 : vector<1x32xf32>
      %34 = arith.divf %32, %33 : vector<1x32xf32>
      %35 = vector.extract_strided_slice %28 {offsets = [0, 32], sizes = [1, 32], strides = [1, 1]} : vector<1x128xf32> to vector<1x32xf32>
      %36 = arith.negf %35 : vector<1x32xf32>
      %37 = math.exp %36 : vector<1x32xf32>
      %cst_20 = arith.constant 1.000000e+00 : f32
      %38 = vector.broadcast %cst_20 : f32 to vector<1x32xf32>
      %39 = arith.addf %38, %37 : vector<1x32xf32>
      %40 = arith.divf %38, %39 : vector<1x32xf32>
      %41 = vector.extract_strided_slice %28 {offsets = [0, 64], sizes = [1, 32], strides = [1, 1]} : vector<1x128xf32> to vector<1x32xf32>
      %42 = math.tanh %41 : vector<1x32xf32>
      %43 = vector.extract_strided_slice %28 {offsets = [0, 96], sizes = [1, 32], strides = [1, 1]} : vector<1x128xf32> to vector<1x32xf32>
      %44 = arith.negf %43 : vector<1x32xf32>
      %45 = math.exp %44 : vector<1x32xf32>
      %cst_21 = arith.constant 1.000000e+00 : f32
      %46 = vector.broadcast %cst_21 : f32 to vector<1x32xf32>
      %47 = arith.addf %46, %45 : vector<1x32xf32>
      %48 = arith.divf %46, %47 : vector<1x32xf32>
      %49 = arith.mulf %40, %17 : vector<1x32xf32>
      %50 = arith.mulf %34, %42 : vector<1x32xf32>
      %51 = arith.addf %49, %50 : vector<1x32xf32>
      %52 = math.tanh %51 : vector<1x32xf32>
      %53 = arith.mulf %48, %52 : vector<1x32xf32>
      %c0_22 = arith.constant 0 : index
      %c0_23 = arith.constant 0 : index
      %54 = vector.load %arg8[%c0_22, %c0_23] : memref<32x128xf32, #tpu.memory_space<vmem>>, vector<32x128xf32>
      %cst_24 = arith.constant dense<0.000000e+00> : vector<1x128xf32>
      %55 = tpu.matmul %51, %54, %cst_24 {dimension_numbers = #tpu.dot_dimension_numbers<[1], [0], [0], [1], [0, 0, 1, 1], [], []>} : vector<1x32xf32>, vector<32x128xf32>, vector<1x128xf32> -> vector<1x128xf32>
      %c0_25 = arith.constant 0 : index
      %c0_26 = arith.constant 0 : index
      %56 = vector.load %arg9[%c0_25, %c0_26] : memref<32x128xf32, #tpu.memory_space<vmem>>, vector<32x128xf32>
      %cst_27 = arith.constant dense<0.000000e+00> : vector<1x128xf32>
      %57 = tpu.matmul %18, %56, %cst_27 {dimension_numbers = #tpu.dot_dimension_numbers<[1], [0], [0], [1], [0, 0, 1, 1], [], []>} : vector<1x32xf32>, vector<32x128xf32>, vector<1x128xf32> -> vector<1x128xf32>
      %58 = arith.addf %55, %57 : vector<1x128xf32>
      %c0_28 = arith.constant 0 : index
      %c0_29 = arith.constant 0 : index
      %59 = vector.load %arg10[%c0_28, %c0_29] : memref<1x128xf32, #tpu.memory_space<vmem>>, vector<1x128xf32>
      %60 = arith.addf %58, %59 : vector<1x128xf32>
      %61 = vector.extract_strided_slice %60 {offsets = [0, 0], sizes = [1, 32], strides = [1, 1]} : vector<1x128xf32> to vector<1x32xf32>
      %62 = arith.negf %61 : vector<1x32xf32>
      %63 = math.exp %62 : vector<1x32xf32>
      %cst_30 = arith.constant 1.000000e+00 : f32
      %64 = vector.broadcast %cst_30 : f32 to vector<1x32xf32>
      %65 = arith.addf %64, %63 : vector<1x32xf32>
      %66 = arith.divf %64, %65 : vector<1x32xf32>
      %67 = vector.extract_strided_slice %60 {offsets = [0, 32], sizes = [1, 32], strides = [1, 1]} : vector<1x128xf32> to vector<1x32xf32>
      %68 = arith.negf %67 : vector<1x32xf32>
      %69 = math.exp %68 : vector<1x32xf32>
      %cst_31 = arith.constant 1.000000e+00 : f32
      %70 = vector.broadcast %cst_31 : f32 to vector<1x32xf32>
      %71 = arith.addf %70, %69 : vector<1x32xf32>
      %72 = arith.divf %70, %71 : vector<1x32xf32>
      %73 = vector.extract_strided_slice %60 {offsets = [0, 64], sizes = [1, 32], strides = [1, 1]} : vector<1x128xf32> to vector<1x32xf32>
      %74 = math.tanh %73 : vector<1x32xf32>
      %75 = vector.extract_strided_slice %60 {offsets = [0, 96], sizes = [1, 32], strides = [1, 1]} : vector<1x128xf32> to vector<1x32xf32>
      %76 = arith.negf %75 : vector<1x32xf32>
      %77 = math.exp %76 : vector<1x32xf32>
      %cst_32 = arith.constant 1.000000e+00 : f32
      %78 = vector.broadcast %cst_32 : f32 to vector<1x32xf32>
      %79 = arith.addf %78, %77 : vector<1x32xf32>
      %80 = arith.divf %78, %79 : vector<1x32xf32>
      %81 = arith.mulf %72, %19 : vector<1x32xf32>
      %82 = arith.mulf %66, %74 : vector<1x32xf32>
      %83 = arith.addf %81, %82 : vector<1x32xf32>
      %84 = math.tanh %83 : vector<1x32xf32>
      %85 = arith.mulf %80, %84 : vector<1x32xf32>
      %86 = tpu.concatenate %53, %51, %85, %83 in 1 : vector<1x32xf32>, vector<1x32xf32>, vector<1x32xf32>, vector<1x32xf32> -> vector<1x128xf32>
      %87 = arith.index_cast %arg15 : i32 to index
      %c0_33 = arith.constant 0 : index
      %88 = vector.load %arg14[%87, %c0_33] : memref<8x128xf32, #tpu.memory_space<vmem>>, vector<1x128xf32>
      tpu.vector_store %arg14[%87, %c0_33], %86 {strides = array<i32>} : memref<8x128xf32, #tpu.memory_space<vmem>>, vector<1x128xf32>,
    }
    %c5_i32_0 = arith.constant 5 : i32
    %c4 = arith.constant 4 : index
    %c0 = arith.constant 0 : index
    %1 = vector.load %arg14[%c4, %c0] : memref<8x128xf32, #tpu.memory_space<vmem>>, vector<1x128xf32>
    %2 = vector.extract_strided_slice %1 {offsets = [0, 96], sizes = [1, 32], strides = [1, 1]} : vector<1x128xf32> to vector<1x32xf32>
    %c0_1 = arith.constant 0 : index
    %c0_2 = arith.constant 0 : index
    %3 = vector.load %arg11[%c0_1, %c0_2] : memref<32x128xf32, #tpu.memory_space<vmem>>, vector<32x128xf32>
    %cst = arith.constant dense<0.000000e+00> : vector<1x128xf32>
    %4 = tpu.matmul %2, %3, %cst {dimension_numbers = #tpu.dot_dimension_numbers<[1], [0], [0], [1], [0, 0, 1, 1], [], []>} : vector<1x32xf32>, vector<32x128xf32>, vector<1x128xf32> -> vector<1x128xf32>
    %c0_3 = arith.constant 0 : index
    %c0_4 = arith.constant 0 : index
    %5 = vector.load %arg12[%c0_3, %c0_4] : memref<1x128xf32, #tpu.memory_space<vmem>>, vector<1x128xf32>
    %6 = arith.addf %4, %5 : vector<1x128xf32>
    %c0_5 = arith.constant 0 : index
    %c0_6 = arith.constant 0 : index
    %7 = vector.load %arg13[%c0_5, %c0_6] : memref<1x128xf32, #tpu.memory_space<vmem>>, vector<1x128xf32>
    tpu.vector_store %arg13[%c0_5, %c0_6], %6 {strides = array<i32>} : memref<1x128xf32, #tpu.memory_space<vmem>>, vector<1x128xf32>,
    return
  }
  func.func @transform_0(%arg0: i32, %arg1: memref<5xi32, #tpu.memory_space<smem>>, %arg2: memref<5xi32, #tpu.memory_space<smem>>, %arg3: memref<4xi32, #tpu.memory_space<smem>>) -> (i32, i32) {
    %c0_i32 = arith.constant 0 : i32
    %c0_i32_0 = arith.constant 0 : i32
    %c0_i32_1 = arith.constant 0 : i32
    return %c0_i32, %c0_i32_0 : i32, i32
  }
  func.func @transform_1(%arg0: i32, %arg1: memref<5xi32, #tpu.memory_space<smem>>, %arg2: memref<5xi32, #tpu.memory_space<smem>>, %arg3: memref<4xi32, #tpu.memory_space<smem>>) -> (i32, i32) {
    %c0_i32 = arith.constant 0 : i32
    %c0_i32_0 = arith.constant 0 : i32
    %c0_i32_1 = arith.constant 0 : i32
    return %c0_i32, %c0_i32_0 : i32, i32
  }
  func.func @transform_2(%arg0: i32, %arg1: memref<5xi32, #tpu.memory_space<smem>>, %arg2: memref<5xi32, #tpu.memory_space<smem>>, %arg3: memref<4xi32, #tpu.memory_space<smem>>) -> (i32, i32) {
    %c0_i32 = arith.constant 0 : i32
    %c0_i32_0 = arith.constant 0 : i32
    %c0_i32_1 = arith.constant 0 : i32
    return %c0_i32, %c0_i32_0 : i32, i32
  }
  func.func @transform_3(%arg0: i32, %arg1: memref<5xi32, #tpu.memory_space<smem>>, %arg2: memref<5xi32, #tpu.memory_space<smem>>, %arg3: memref<4xi32, #tpu.memory_space<smem>>) -> (i32, i32) {
    %c0_i32 = arith.constant 0 : i32
    %c0_i32_0 = arith.constant 0 : i32
    %c0_i32_1 = arith.constant 0 : i32
    return %c0_i32, %c0_i32_0 : i32, i32
  }
  func.func @transform_4(%arg0: i32, %arg1: memref<5xi32, #tpu.memory_space<smem>>, %arg2: memref<5xi32, #tpu.memory_space<smem>>, %arg3: memref<4xi32, #tpu.memory_space<smem>>) -> (i32, i32) {
    %c0_i32 = arith.constant 0 : i32
    %c0_i32_0 = arith.constant 0 : i32
    %c0_i32_1 = arith.constant 0 : i32
    return %c0_i32, %c0_i32_0 : i32, i32
  }
  func.func @transform_5(%arg0: i32, %arg1: memref<5xi32, #tpu.memory_space<smem>>, %arg2: memref<5xi32, #tpu.memory_space<smem>>, %arg3: memref<4xi32, #tpu.memory_space<smem>>) -> (i32, i32) {
    %c0_i32 = arith.constant 0 : i32
    %c0_i32_0 = arith.constant 0 : i32
    %c0_i32_1 = arith.constant 0 : i32
    return %c0_i32, %c0_i32_0 : i32, i32
  }
  func.func @transform_6(%arg0: i32, %arg1: memref<5xi32, #tpu.memory_space<smem>>, %arg2: memref<5xi32, #tpu.memory_space<smem>>, %arg3: memref<4xi32, #tpu.memory_space<smem>>) -> (i32, i32) {
    %c0_i32 = arith.constant 0 : i32
    %c0_i32_0 = arith.constant 0 : i32
    %c0_i32_1 = arith.constant 0 : i32
    return %c0_i32, %c0_i32_0 : i32, i32
  }
  func.func @transform_7(%arg0: i32, %arg1: memref<5xi32, #tpu.memory_space<smem>>, %arg2: memref<5xi32, #tpu.memory_space<smem>>, %arg3: memref<4xi32, #tpu.memory_space<smem>>) -> (i32, i32) {
    %c0_i32 = arith.constant 0 : i32
    %c0_i32_0 = arith.constant 0 : i32
    %c0_i32_1 = arith.constant 0 : i32
    return %c0_i32, %c0_i32_0 : i32, i32
  }
  func.func @transform_8(%arg0: i32, %arg1: memref<5xi32, #tpu.memory_space<smem>>, %arg2: memref<5xi32, #tpu.memory_space<smem>>, %arg3: memref<4xi32, #tpu.memory_space<smem>>) -> (i32, i32) {
    %c0_i32 = arith.constant 0 : i32
    %c0_i32_0 = arith.constant 0 : i32
    %c0_i32_1 = arith.constant 0 : i32
    return %c0_i32, %c0_i32_0 : i32, i32
  }
  func.func @transform_9(%arg0: i32, %arg1: memref<5xi32, #tpu.memory_space<smem>>, %arg2: memref<5xi32, #tpu.memory_space<smem>>, %arg3: memref<4xi32, #tpu.memory_space<smem>>) -> (i32, i32) {
    %c0_i32 = arith.constant 0 : i32
    %c0_i32_0 = arith.constant 0 : i32
    %c0_i32_1 = arith.constant 0 : i32
    return %c0_i32, %c0_i32_0 : i32, i32
  }
}

</mosaic_0001>

<bundles_post_ra>
// kernel: tpu_custom_call.1
= control target key start
LH: loop header
LB: loop body
LE: loop exit
PB: predicated region body
PF: predicated region fallthrough
CT: control target
= control target key end

     0   :  { %s767_s27 = smov [#allocation4]   ;;  %s768_s28 = smov [#allocation5]   ;;  %s941_s0 = inlined_call_operand.hbm [shape: s32[5], index: 0, kind: input, shape index: {}]   ;;  %s942_s3 = inlined_call_operand.hbm [shape: f32[8,32], index: 3, kind: input, shape index: {}]   ;;  %s943_s4 = inlined_call_operand.hbm [shape: f32[32,128], index: 4, kind: input, shape index: {}]   ;;  %s944_s5 = inlined_call_operand.hbm [shape: f32[32,128], index: 5, kind: input, shape index: {}]   ;;  %s945_s6 = inlined_call_operand.vmem [shape: f32[1,128], index: 6, kind: input, shape index: {}]   ;;  %s946_s7 = inlined_call_operand.hbm [shape: f32[32,128], index: 7, kind: input, shape index: {}]   ;;  %s947_s8 = inlined_call_operand.hbm [shape: f32[32,128], index: 8, kind: input, shape index: {}]   ;;  %s948_s9 = inlined_call_operand.vmem [shape: f32[1,128], index: 9, kind: input, shape index: {}]   ;;  %s949_s10 = inlined_call_operand.hbm [shape: f32[32,128], index: 10, kind: input, shape index: {}]   ;;  %s950_s11 = inlined_call_operand.vmem [shape: f32[1,128], index: 11, kind: input, shape index: {}]   ;;  %s951_s12 = inlined_call_operand.hbm [shape: f32[1,128], index: 12, kind: output, shape index: {}]   ;;  %s952_s1 = inlined_call_operand.hbm [shape: s32[5], index: 1, kind: input, shape index: {}]   ;;  %s953_s2 = inlined_call_operand.vmem [shape: s32[4], index: 2, kind: input, shape index: {}]  }
   0x1   :  { %s18_s23 = sshll.u32 %s941_s0, 4  ;;  %s23_s26 = sshll.u32 %s952_s1, 4  ;;  %s19_s23 = int_to_ptr.hbm [resolvable:$true] %s18_s23  ;;  %s24_s26 = int_to_ptr.hbm [resolvable:$true] %s23_s26 }
   0x2   :  { %21 = dma.hbm_to_smem %s19_s23, 16, %s767_s27, [#allocation3] }
   0x3   :  { %26 = dma.hbm_to_smem %s24_s26, 16, %s768_s28, [#allocation3] }
   0x4   :  { %s28_s13 = sshll.u32 %s953_s2, 4  ;;  %s769_s14 = smov [#allocation6]   ;;  %s29_s13 = int_to_ptr.vmem [resolvable:$true] %s28_s13 }
   0x5   :  { %31 = dma.vmem_to_smem %s29_s13, 16, %s769_s14, [#allocation3] }
   0x6   :  { %739 = dma.done.wait [#allocation3], 48 }
   0x7   :  { %740 = vsyncadd [#allocation3], 4294967248 }
   0x8   :  { %34 = sfence }
   0x9   :  { %35 = vsyncpa [#allocation8], 0 }
   0xa   :  { %36 = vsyncpa [#allocation11], 0 }
   0xb   :  { %37 = vsyncpa [#allocation14], 0 }
   0xc   :  { %38 = vsyncpa [#allocation17], 0  ;;  %s55_s15 = sshll.u32 %s943_s4, 4  ;;  %s56_s15 = int_to_ptr.hbm [resolvable:$true] %s55_s15 }
   0xd   :  { %39 = vsyncpa [#allocation9], 0  ;;  %s770_s16 = smov [#allocation10]   ;;  %s83_s19 = sshll.u32 %s946_s7, 4  ;;  %s84_s19 = int_to_ptr.hbm [resolvable:$true] %s83_s19 }
   0xe   :  { %s57_s17 = sshll.u32 %s770_s16, 4  ;;  %s771_s20 = smov 128   ;;  %s58_s17 = int_to_ptr.vmem [resolvable:$true] %s57_s17 }
   0xf   :  { %s772_s21 = smov 8   ;;  %s773_s22 = smov [#allocation13]  }
  0x10   :  { %63 = dma.hbm_to_vmem [thread:$0]  %s56_s15, 512, %s58_s17, [#allocation11], %s771_s20, %s771_s20, %s772_s21  }
  0x11   :  { %s85_s23 = sshll.u32 %s773_s22, 4  ;;  %s45_s25 = sshll.u32 %s942_s3, 4  ;;  %s86_s23 = int_to_ptr.vmem [resolvable:$true] %s85_s23  ;;  %s46_s25 = int_to_ptr.hbm [resolvable:$true] %s45_s25 }
  0x12   :  { %91 = dma.hbm_to_vmem [thread:$0]  %s84_s19, 512, %s86_s23, [#allocation14], %s771_s20, %s771_s20, %s772_s21  }
  0x13   :  { %s68_s27 = sshll.u32 %s944_s5, 4  ;;  %s774_s28 = smov [#allocation7]   ;;  %s69_s27 = int_to_ptr.hbm [resolvable:$true] %s68_s27 }
  0x14   :  { %s47_s29 = sshll.u32 %s774_s28, 4  ;;  %s775_s30 = smov [#allocation12]   ;;  %s48_s29 = int_to_ptr.vmem [resolvable:$true] %s47_s29 }
  0x15   :  { %50 = dma.hbm_to_vmem [thread:$0]  %s46_s25, 128, %s48_s29, [#allocation8]  }
  0x16   :  { %s70_s13 = sshll.u32 %s775_s30, 4  ;;  %s96_s3 = sshll.u32 %s947_s8, 4  ;;  %s71_s13 = int_to_ptr.vmem [resolvable:$true] %s70_s13  ;;  %s97_s3 = int_to_ptr.hbm [resolvable:$true] %s96_s3 }
  0x17   :  { %76 = dma.hbm_to_vmem [thread:$0]  %s69_s27, 512, %s71_s13, [#allocation11], %s771_s20, %s771_s20, %s772_s21  }
  0x18   :  { %s111_s5 = sshll.u32 %s949_s10, 4  ;;  %s776_s16 = smov [#allocation15]   ;;  %s112_s5 = int_to_ptr.hbm [resolvable:$true] %s111_s5 }
  0x19   :  { %s98_s17 = sshll.u32 %s776_s16, 4  ;;  %s777_s2 = smov [#allocation16]   ;;  %s99_s17 = int_to_ptr.vmem [resolvable:$true] %s98_s17 }
  0x1a   :  { %104 = dma.hbm_to_vmem [thread:$0]  %s97_s3, 512, %s99_s17, [#allocation14], %s771_s20, %s771_s20, %s772_s21  }
  0x1b   :  { %s113_s8 = sshll.u32 %s777_s2, 4  ;;  %s114_s8 = int_to_ptr.vmem [resolvable:$true] %s113_s8 }
  0x1c   :  { %119 = dma.hbm_to_vmem [thread:$0]  %s112_s5, 512, %s114_s8, [#allocation17], %s771_s20, %s771_s20, %s772_s21  }
  0x1d   :  { %741 = dma.done.wait [#allocation8], 128  }
  0x1e   :  { %742 = vsyncadd [#allocation8], 4294967168 }
  0x1f   :  { %743 = dma.done.wait [#allocation11], 1024  }
  0x20   :  { %744 = vsyncadd [#allocation11], 4294966272 }
  0x21   :  { %745 = dma.done.wait [#allocation14], 1024  }
  0x22   :  { %746 = vsyncadd [#allocation14], 4294966272 }
  0x23   :  { %747 = dma.done.wait [#allocation17], 512  }
  0x24   :  { %748 = vsyncadd [#allocation17], 4294966784  ;;  %s890_s10 = smov 0  }
  0x25 LB: > { %s152_s18 = sld [smem:[#allocation4 + %s753_s10]]  ;;  %v763_v0 = vmov 0.0   ;;  %s753_s10 = sphi %s890_s10, %s151_s10  }
  0x26   : > { %s153_s19 = sld [smem:[#allocation5 + %s753_s10]] }
  0x2c   : > { %p447_p0 = scmp.le.s32.totalorder %s153_s19, 0 }
  0x2d   : > { %s759_s20 = smov (!%p447_p0), 0  }
  0x2e   : > { %437 = sbr.rel (%p447_p0) target bundleno = 64 (0x40), region = 91 }
  0x33   : > { %v755_v1 = vmov 0.0  }
  0x34 LB: >> { %s161_s21 = sadd.s32 %s761_s20, %s152_s18  ;;  %s157_s20 = sadd.s32 1, %s761_s20   ;;  %s761_s20 = sphi %s759_s20, %s157_s20   ;;  %v757_v1 = vphi %v755_v1, %v756_v1  }
  0x35   : >> { %s162_s22 = sld [smem:[#allocation6 + %s161_s21]]  ;;  %p156_p1 = scmp.ge.s32.totalorder %s157_s20, %s153_s19 }
  0x3b   : >> { %s163_s23 = scalar_lea.vmem [#allocation2], %s162_s22  ;;  %159 = sbr.rel (!%p156_p1) target bundleno = 52 (0x34), region = 97 }
  0x3c   : >> { %v164_v2 = vld [vmem:[%s163_s23] sm:$0x1] }
  0x3d   : >> { %v165_v3 = vadd.f32 %v757_v1, %v164_v2  }
  0x3f   : >> { %v756_v1 = vmov %v165_v3   ;;  %v764_v0 = vmov (%p156_p1), %v165_v3  }
  0x40 PF: > { %v175_v4 = vld [vmem:[#allocation12 + $0x18] sm:$0xff]  ;;  %v174_v6 = vld [vmem:[#allocation12 + $0x10] sm:$0xff]  ;;  %v173_v8 = vld [vmem:[#allocation12 + $0x8] sm:$0xff]  ;;  %vm176_vm0 = vcmask 261120   ;;  %s166_s24 = scalar_lea.vmem [#allocation7], %s753_s10  ;;  %s778_s4 = smov 64   ;;  %v765_v0 = vphi %v763_v0, %v764_v0  }
  0x41   : > { %v171_v5 = vld [vmem:[#allocation10 + $0x18] sm:$0xff]  ;;  %192 = vmatpush.msra.mxu0 %v175_v4  ;;  %v170_v7 = vld [vmem:[#allocation10 + $0x10] sm:$0xff]  ;;  %v169_v9 = vld [vmem:[#allocation10 + $0x8] sm:$0xff]  ;;  %270 = vrot.lane.b32.xlu1 %v765_v0, %s778_s4  ;;  %s779_s26 = smov 32   ;;  %s780_s27 = smov 96   ;;  %vm372_vm9 = vcmask 523264  }
  0x42   : > { %215 = vmatpush.msra.mxu1 %v171_v5  ;;  %v172_v10 = vld [vmem:[#allocation12] sm:$0xff]  ;;  %v167_v12 = vld [vmem:[%s166_s24] sm:$0x1]  ;;  %v269_v34 = vld [vmem:[#allocation15 + $0x18] sm:$0xff]  ;;  %vm374_vm10 = vcmask 785408   ;;  %s376_s30 = scalar_lea.vmem [#allocation2], %s753_s10 }
  0x43   : > { %193 = vmatpush.msra.mxu0 %v174_v6  ;;  %v168_v11 = vld [vmem:[#allocation10] sm:$0xff]  ;;  %v223_v15 = vld [vmem:[%s945_s6] sm:$0x1]  ;;  %286 = vmatpush.msra.mxu2 %v269_v34  ;;  %v265_v36 = vld [vmem:[#allocation13 + $0x18] sm:$0xff]  ;;  %s151_s10 = sadd.s32 1, %s753_s10  }
  0x44   : > { %216 = vmatpush.msra.mxu1 %v170_v7  ;;  %v268_v35 = vld [vmem:[#allocation15 + $0x10] sm:$0xff]  ;;  %v267_v38 = vld [vmem:[#allocation15 + $0x8] sm:$0xff]  ;;  %311 = vmatpush.msra.mxu3 %v265_v36  ;;  %v266_v40 = vld [vmem:[#allocation15] sm:$0xff]  ;;  %p148_p2 = scmp.ge.s32.totalorder %s151_s10, 5  }
  0x45   : > { %194 = vmatpush.msra.mxu0 %v173_v8  ;;  %v264_v37 = vld [vmem:[#allocation13 + $0x10] sm:$0xff]  ;;  %287 = vmatpush.msra.mxu2 %v268_v35  ;;  %v263_v39 = vld [vmem:[#allocation13 + $0x8] sm:$0xff]  ;;  %v262_v42 = vld [vmem:[#allocation13] sm:$0xff]  ;;  %s781_s13 = smov (%p148_p2), 32   ;;  %s782_s3 = smov (%p148_p2), [#allocation18]  }
  0x46   : > { %217 = vmatpush.msra.mxu1 %v169_v9  ;;  %312 = vmatpush.msra.mxu3 %v264_v37  ;;  %v319_v50 = vld [vmem:[%s948_s9] sm:$0x1]  ;;  %s416_s1 = sshll.u32 (%p148_p2), %s782_s3, 4  ;;  %s418_s15 = sshll.u32 (%p148_p2), %s951_s12, 4  ;;  %s417_s1 = int_to_ptr.vmem [resolvable:$true] %s416_s1  ;;  %s419_s15 = int_to_ptr.hbm [resolvable:$true] %s418_s15 }
  0x47   : > { %195 = vmatpush.msra.mxu0 %v172_v10  ;;  %288 = vmatpush.msra.mxu2 %v267_v38 }
  0x48   : > { %218 = vmatpush.msra.mxu1 %v168_v11  ;;  %448 = vmatmul.msk.f32.vlgmr.msra.gmra.mxu0 %vm176_vm0, %v765_v0 }
  0x49   : > { %449 = vmatmul.msk.f32.vlgmr.msra.gmra.mxu1 %vm176_vm0, %v167_v12  ;;  %313 = vmatpush.msra.mxu3 %v263_v39 }
  0x4a   : > { %289 = vmatpush.msra.mxu2 %v266_v40 }
  0x4b   : > { %314 = vmatpush.msra.mxu3 %v262_v42 }
  0xb3   : > { %v271_v41 = vpop.permute.xlu1 %270 }
  0xb4   : > { %451 = vmatmul.msk.f32.vlgmr.msra.gmra.mxu2 %vm176_vm0, %v271_v41 }
  0xc5   : > { %v197_v13 = vpop.f32.mrf.mxu0 }
  0xc6   : > { %v220_v14 = vpop.f32.mrf.mxu1 }
  0xc7   : > { %v221_v16 = vadd.f32 %v220_v14, %v197_v13 }
  0xc9   : > { %v224_v17 = vadd.f32 %v223_v15, %v221_v16 }
  0xcb   : > { %503 = vtanh.f32 %v224_v17  ;;  %v450_v19 = vmul.f32 -1.442695, %v224_v17 }
  0xcd   : > { %505 = vpow2.f32 %v450_v19 }
  0xd1   : > { %v504_v18 = vpop.eup %503 }
  0xd2   : > { %247 = vrot.lane.b32.xlu0 %v504_v18, %s778_s4 }
  0xd3   : > { %v506_v20 = vpop.eup %505 }
  0xd4   : > { %v228_v21 = vadd.f32 1.0, %v506_v20  ;;  %v382_v20 = vld [vmem:[#allocation16 + $0x18] sm:$0xff] (%p148_p2) }
  0xd5   :  { %402 = vmatpush.msra.mxu0 (%p148_p2), %v382_v20 }
  0xd6   : > { %507 = vrcp.f32 %v228_v21  ;;  %v240_v27 = vand.u32 2147483648, %v228_v21  ;;  %vm234_vm2 = vweird.f32 %v228_v21  ;;  %v238_v28 = vand.u32 2147483647, %v228_v21 }
  0xd8   : > { %v241_v30 = vor.u32 1.1754944e-38, %v240_v27  ;;  %vm239_vm4 = vcmp.eq.f32.partialorder %v238_v28, 8.507059e+37 }
  0xdc   : > { %v508_v22 = vpop.eup %507 }
  0xdd   : > { %v230_v23 = vmul.f32 %v508_v22, %v228_v21  ;;  %vm235_vm1 = vweird.f32 %v508_v22  ;;  %v381_v21 = vld [vmem:[#allocation16 + $0x10] sm:$0xff] (%p148_p2) }
  0xde   : > { %vm236_vm3 = vmor %vm234_vm2, %vm235_vm1  ;;  %403 = vmatpush.msra.mxu0 (%p148_p2), %v381_v21 }
  0xdf   : > { %v231_v24 = vsub.f32 1.0, %v230_v23  ;;  %v379_v23 = vld [vmem:[#allocation16] sm:$0xff] (%p148_p2) }
  0xe1   : > { %v232_v25 = vmul.f32 %v508_v22, %v231_v24 }
  0xe3   : > { %v233_v26 = vadd.f32 %v508_v22, %v232_v25  ;;  %v383_v25 = vld [vmem:[%s950_s11] sm:$0x1] (%p148_p2) }
  0xe5   : > { %v237_v29 = vsel %vm236_vm3, %v508_v22, %v233_v26  ;;  %v380_v22 = vld [vmem:[#allocation16 + $0x8] sm:$0xff] (%p148_p2) }
  0xe6   : > { %v909_v32 = vsel %vm239_vm4, %v241_v30, %v237_v29  ;;  %404 = vmatpush.msra.mxu0 (%p148_p2), %v380_v22 }
  0xe7   : > { %v245_v43 = vmul.f32 %v765_v0, %v909_v32 }
  0xe8   :  { %405 = vmatpush.msra.mxu0 (%p148_p2), %v379_v23 }
 0x137   : > { %v291_v48 = vpop.f32.mrf.mxu2 }
 0x144   : > { %v248_v31 = vpop.permute.xlu0 %247 }
 0x145   : > { %v250_v33 = vmul.f32 %v248_v31, %v909_v32 }
 0x147   : > { %252 = vrot.lane.b32.xlu0 %v250_v33, %s779_s26 }
 0x1b9   : > { %v253_v44 = vpop.permute.xlu0 %252 }
 0x1ba   : > { %v255_v45 = vadd.f32 %v253_v44, %v245_v43 }
 0x1bc   : > { %509 = vtanh.f32 %v255_v45  ;;  %295 = vrot.lane.b32.xlu1 %v255_v45, %s780_s27 }
 0x1c2   : > { %v510_v46 = vpop.eup %509 }
 0x1c3   : > { %258 = vrot.lane.b32.xlu0 %v510_v46, %s778_s4 }
 0x22e   : > { %v296_v47 = vpop.permute.xlu1 %295 }
 0x22f   : > { %452 = vmatmul.msk.f32.vlgmr.msra.gmra.mxu3 %vm176_vm0, %v296_v47 }
 0x235   : > { %v259_v5 = vpop.permute.xlu0 %258 }
 0x236   : > { %v261_v6 = vmul.f32 %v259_v5, %v909_v32 }
 0x2b2   : > { %v316_v49 = vpop.f32.mrf.mxu3 }
 0x2b3   : > { %v317_v51 = vadd.f32 %v316_v49, %v291_v48 }
 0x2b5   : > { %v320_v52 = vadd.f32 %v319_v50, %v317_v51 }
 0x2b7   : > { %511 = vtanh.f32 %v320_v52  ;;  %v453_v54 = vmul.f32 -1.442695, %v320_v52 }
 0x2b9   : > { %513 = vpow2.f32 %v453_v54 }
 0x2bd   : > { %v512_v53 = vpop.eup %511 }
 0x2be   : > { %344 = vrot.lane.b32.xlu2 %v512_v53, %s778_s4 }
 0x2bf   : > { %v514_v55 = vpop.eup %513 }
 0x2c0   : > { %v324_v56 = vadd.f32 1.0, %v514_v55 }
 0x2c2   : > { %515 = vrcp.f32 %v324_v56  ;;  %v336_v62 = vand.u32 2147483648, %v324_v56  ;;  %vm330_vm6 = vweird.f32 %v324_v56  ;;  %v334_v63 = vand.u32 2147483647, %v324_v56 }
 0x2c4   : > { %v337_v1 = vor.u32 1.1754944e-38, %v336_v62  ;;  %vm335_vm8 = vcmp.eq.f32.partialorder %v334_v63, 8.507059e+37 }
 0x2c8   : > { %v516_v57 = vpop.eup %515 }
 0x2c9   : > { %v326_v58 = vmul.f32 %v516_v57, %v324_v56  ;;  %vm331_vm5 = vweird.f32 %v516_v57 }
 0x2ca   : > { %vm332_vm7 = vmor %vm330_vm6, %vm331_vm5 }
 0x2cb   : > { %v327_v59 = vsub.f32 1.0, %v326_v58 }
 0x2cd   : > { %v328_v60 = vmul.f32 %v516_v57, %v327_v59 }
 0x2cf   : > { %v329_v61 = vadd.f32 %v516_v57, %v328_v60 }
 0x2d1   : > { %v333_v0 = vsel %vm332_vm7, %v516_v57, %v329_v61 }
 0x2d2   : > { %v338_v3 = vsel %vm335_vm8, %v337_v1, %v333_v0 }
 0x2d3   : > { %v342_v7 = vmul.f32 %v338_v3, %v271_v41 }
 0x318   : > { %v345_v2 = vpop.permute.xlu2 %344 }
 0x319   : > { %v347_v4 = vmul.f32 %v345_v2, %v338_v3 }
 0x31b   : > { %349 = vrot.lane.b32.xlu2 %v347_v4, %s779_s26 }
 0x323   : > { %360 = vrot.lane.b32.xlu2 %v261_v6, %s779_s26 }
 0x375   : > { %v350_v8 = vpop.permute.xlu2 %349 }
 0x376   : > { %v352_v9 = vadd.f32 %v350_v8, %v342_v7 }
 0x378   : > { %517 = vtanh.f32 %v352_v9 }
 0x37d   : > { %v361_v13 = vpop.permute.xlu2 %360 }
 0x37e   : > { %v518_v10 = vpop.eup %517  ;;  %v371_v14 = vsel %vm176_vm0, %v361_v13, %v255_v45 }
 0x37f   : > { %355 = vrot.lane.b32.xlu1 %v518_v10, %s778_s4 }
 0x387   : > { %368 = vrot.lane.b32.xlu1 %v352_v9, %s778_s4 }
 0x3f1   : > { %v356_v11 = vpop.permute.xlu1 %355 }
 0x3f2   : > { %v358_v12 = vmul.f32 %v356_v11, %v338_v3 }
 0x3f4   : > { %364 = vrot.lane.b32.xlu0 %v358_v12, %s780_s27 }
 0x3f9   : > { %v369_v16 = vpop.permute.xlu1 %368 }
 0x465   :  { %150 = sbr.rel (!%p148_p2) target bundleno = 37 (0x25), region = 108 }
 0x466   : > { %v365_v15 = vpop.permute.xlu0 %364 }
 0x467   : > { %v373_v17 = vsel %vm372_vm9, %v371_v14, %v365_v15 }
 0x468   : > { %v375_v18 = vsel %vm374_vm10, %v373_v17, %v369_v16 }
 0x469   : > { %377 = vst [vmem:[%s376_s30] sm:$0x1] %v375_v18 }
 0x470   :  { %v378_v19 = vld [vmem:[#allocation2 + $0x4] sm:$0x1] }
 0x471   :  { %385 = vrot.lane.b32.xlu0 %v378_v19, %s781_s13 }
 0x4e3   :  { %v386_v24 = vpop.permute.xlu0 %385 }
 0x4e4   :  { %454 = vmatmul.msk.f32.vlgmr.msra.gmra.mxu0 %vm176_vm0, %v386_v24 }
 0x561   :  { %v407_v26 = vpop.f32.mrf.mxu0 }
 0x562   :  { %v408_v27 = vadd.f32 %v407_v26, %v383_v25 }
 0x564   :  { %410 = vst [vmem:[#allocation18] sm:$0x1] %v408_v27 }
 0x565   :  { %421 = dma.vmem_to_hbm [thread:$0]  %s417_s1, 16, %s419_s15, [#allocation9]  }
 0x566   :  { %749 = dma.done.wait [#allocation9], 16  }
 0x567   :  { %750 = vsyncadd [#allocation9], 4294967280 }
 0x568   :  { %426 = vsyncpa [#allocation8], 1 }
 0x569   :  { %427 = vsyncpa [#allocation11], 1 }
 0x56a   :  { %428 = vsyncpa [#allocation14], 1 }
 0x56b   :  { %429 = vsyncpa [#allocation17], 1 }
 0x56c   :  { %430 = vsyncpa [#allocation9], 1 }

</bundles_post_ra>
